<compile_context>
chip_gen: v7x
topology: tpu7x:2x2x1
jax: 0.10.0
libtpu: 0.0.40
codegen_flags: <defaults>
</compile_context>

<pallas_src>
import math

import jax
import jax.numpy as jnp
from jax.experimental import pallas as pl
from jax.experimental.pallas import tpu as pltpu


def _round_up(x, m):
    return ((x + m - 1) // m) * m


def _choose_dim_p(dim):
    # <=128: tight 128-lane padding (matches v5e MXU).  >128: align to 256 so
    # K and N=2*dim_p fill the v6e/v7x 256x256 MXU tiles.
    return _round_up(dim, 128) if dim <= 128 else _round_up(dim, 256)


def _vmem_capacity_bytes():
    try:
        return int(pltpu.get_tpu_info().vmem_capacity_bytes)
    except Exception:
        return 64 * 1024 * 1024  # conservative: v7x per-TC VMEM


def _footprint(tr, dim_p, dim, d1, d2, in_itemsize, out_itemsize, w_bytes):
    """Per-generation VMEM footprint estimate for one row tile."""
    scratch = tr * dim_p * 4                               # f32 concat scratch
    temps = 6 * tr * dim_p * 4                             # hg(2x)+h+g+x +margin
    io = 2 * tr * (d1 + d2) * in_itemsize + 2 * tr * dim * out_itemsize
    return 2 * w_bytes + scratch + temps + io              # weights double-buf'd


def _pick_row_tile(rows, dim_p, dim, d1, d2, in_itemsize, out_itemsize,
                   w_bytes, budget_bytes, max_tile=1024):
    tr = max_tile
    while tr > 8 and _footprint(tr, dim_p, dim, d1, d2, in_itemsize,
                                out_itemsize, w_bytes) > budget_bytes:
        tr //= 2
    tr = max(tr, 8)
    # Keep >= 2 row tiles so the "parallel" axis can shard across both v7x
    # TensorCores (one extra ~0.35us grid step is noise on 1-TC v5e/v6e).
    if rows > 8:
        tr = min(tr, _round_up((rows + 1) // 2, 8))
    return min(tr, _round_up(rows, 8))


def pack_params(wh_t, bh, wg_t, bg, dim_p):
    """Pad Wh/Wg to (dim_p, dim_p) with zeros and fuse into one bf16 weight.

    wh_t/wg_t: (L, dim, dim) already transposed (kernel computes x @ W.T as in
    nn.Linear).  bh/bg: (L, dim).  Returns:
      w_cat: (L, dim_p, 2*dim_p) bf16,  b_cat: (L, 1, 2*dim_p) f32.
    Zero-padded weight rows/cols and zero-padded biases guarantee padded
    activation lanes stay exactly 0 through every layer.
    """
    L, dim, _ = wh_t.shape
    pad = dim_p - dim
    whp = jnp.pad(wh_t, ((0, 0), (0, pad), (0, pad)))
    wgp = jnp.pad(wg_t, ((0, 0), (0, pad), (0, pad)))
    w_cat = jnp.concatenate([whp, wgp], axis=-1).astype(jnp.bfloat16)
    bhp = jnp.pad(bh, ((0, 0), (0, pad)))
    bgp = jnp.pad(bg, ((0, 0), (0, pad)))
    b_cat = jnp.concatenate([bhp, bgp], axis=-1)[:, None, :].astype(jnp.float32)
    return w_cat, b_cat


def highway_forward(x1, x2, w_cat, b_cat):
    """x1: (..., D1), x2: (..., D2); w_cat/b_cat from pack_params."""
    D1 = x1.shape[-1]
    D2 = x2.shape[-1]
    dim = D1 + D2
    lead = x1.shape[:-1]
    assert x2.shape[:-1] == lead
    rows = int(math.prod(lead)) if lead else 1

    num_layers, dim_p, two_dim_p = w_cat.shape
    assert two_dim_p == 2 * dim_p and dim_p >= dim and dim_p % 128 == 0

    out_dtype = x1.dtype
    in_itemsize = jnp.dtype(x1.dtype).itemsize
    out_itemsize = jnp.dtype(out_dtype).itemsize

    # One buffer of the fused bf16 weights + f32 biases.
    w_bytes = num_layers * (dim_p * 2 * dim_p * 2 + 2 * dim_p * 4)
    cap = _vmem_capacity_bytes()
    budget = int(0.6 * cap)
    # TODO(synk): fall back to a streamed per-layer weight pipeline (layer grid
    # axis) if the fused weights ever exceed the VMEM budget; highway stacks
    # are shallow so this does not trigger in practice.
    assert 2 * w_bytes < budget, "fused highway weights do not fit in VMEM"

    tr = _pick_row_tile(rows, dim_p, dim, D1, D2, in_itemsize, out_itemsize,
                        w_bytes, budget)
    rows_p = _round_up(rows, tr)
    num_row_tiles = rows_p // tr

    x1f = x1.reshape(rows, D1)
    x2f = x2.reshape(rows, D2)
    if rows_p != rows:
        x1f = jnp.pad(x1f, ((0, rows_p - rows), (0, 0)))
        x2f = jnp.pad(x2f, ((0, rows_p - rows), (0, 0)))

    est = _footprint(tr, dim_p, dim, D1, D2, in_itemsize, out_itemsize, w_bytes)
    vmem_limit = int(min(max(32 * 1024 * 1024, 2 * est), 0.85 * cap))

    def kernel(x1_ref, x2_ref, w_ref, b_ref, o_ref, x_sc):
        # Build the concatenated, zero-padded f32 activation once per row tile.
        # Only the padded tail needs zeroing (saves a full tr*dim_p store pass);
        # padded lanes stay 0 across layers because weight/bias pads are 0.
        if dim_p > dim:
            x_sc[:, dim:] = jnp.zeros((tr, dim_p - dim), jnp.float32)
        x_sc[:, 0:D1] = x1_ref[...].astype(jnp.float32)
        x_sc[:, D1:dim] = x2_ref[...].astype(jnp.float32)
        x = x_sc[...]                                        # (tr, dim_p) f32

        # All layer weights are VMEM-resident: unrolled static loop, one fused
        # lane-dense bf16 MXU matmul + f32 epilogue per layer.
        for l in range(num_layers):
            hg = jnp.dot(x.astype(jnp.bfloat16), w_ref[l],
                         preferred_element_type=jnp.float32) + b_ref[l]
            h = jnp.maximum(hg[:, :dim_p], 0.0)              # ReLU half
            # sigmoid = 1 / (1 + exp(-z)) with the reciprocal on the EUP slot.
            g = pl.reciprocal(1.0 + jnp.exp(-hg[:, dim_p:]), approx=True)
            x = h + g * (x - h)                              # (1-g)*h + g*x

        # Emit only the real feature lanes (no dim_p-wide HBM write + re-slice).
        o_ref[...] = x[:, 0:dim].astype(o_ref.dtype)

    out = pl.pallas_call(
        kernel,
        out_shape=jax.ShapeDtypeStruct((rows_p, dim), out_dtype),
        grid_spec=pltpu.PrefetchScalarGridSpec(
            num_scalar_prefetch=0,
            grid=(num_row_tiles,),
            in_specs=[
                pl.BlockSpec((tr, D1), lambda r: (r, 0)),
                pl.BlockSpec((tr, D2), lambda r: (r, 0)),
                # Whole weight / bias stacks with a constant index_map:
                # fetched from HBM once, resident for every row tile.
                pl.BlockSpec((num_layers, dim_p, 2 * dim_p), lambda r: (0, 0, 0)),
                pl.BlockSpec((num_layers, 1, 2 * dim_p), lambda r: (0, 0, 0)),
            ],
            out_specs=pl.BlockSpec((tr, dim), lambda r: (r, 0)),
            scratch_shapes=[pltpu.VMEM((tr, dim_p), jnp.float32)],
        ),
        compiler_params=pltpu.CompilerParams(
            dimension_semantics=("parallel",),
            vmem_limit_bytes=vmem_limit),
    )(x1f, x2f, w_cat, b_cat)

    if rows_p != rows:
        out = out[:rows]
    return out.reshape(*lead, dim)


def init_params(key, num_layers, dim, dtype=jnp.float32):
    """nn.Linear-style init; gate bias filled with 1 (as in the PyTorch module)."""
    bound = 1.0 / math.sqrt(dim)
    k0, k1, k2 = jax.random.split(key, 3)
    # Stored already transposed: (L, in_dim, out_dim) so forward does x @ W.T.
    wh_t = jax.random.uniform(k0, (num_layers, dim, dim),
                              minval=-bound, maxval=bound, dtype=dtype)
    bh = jax.random.uniform(k1, (num_layers, dim),
                            minval=-bound, maxval=bound, dtype=dtype)
    wg_t = jax.random.uniform(k2, (num_layers, dim, dim),
                              minval=-bound, maxval=bound, dtype=dtype)
    bg = jnp.ones((num_layers, dim), dtype=dtype)    # gate.bias.data.fill_(1)
    return wh_t, bh, wg_t, bg


def reference_forward(x1, x2, wh_t, bh, wg_t, bg):
    """Pure-JAX f32 reference matching the PyTorch forward."""
    x = jnp.concatenate([x1, x2], axis=-1)
    for i in range(wh_t.shape[0]):
        h = jax.nn.relu(x @ wh_t[i] + bh[i])
        g = jax.nn.sigmoid(x @ wg_t[i] + bg[i])
        x = (1 - g) * h + g * x
    return x


if __name__ == "__main__":
    config = {"highway_layers": 2, "highway_dim1": 16, "highway_dim2": 16}
    B, S = 2, 8
    D1, D2 = config["highway_dim1"], config["highway_dim2"]
    dim = D1 + D2
    L = config["highway_layers"]

    key = jax.random.PRNGKey(0)
    k1, k2, kp = jax.random.split(key, 3)
    x1 = jax.random.normal(k1, (B, S, D1), dtype=jnp.float32)
    x2 = jax.random.normal(k2, (B, S, D2), dtype=jnp.float32)

    wh_t, bh, wg_t, bg = init_params(kp, L, dim)
    dim_p = _choose_dim_p(dim)
    w_cat, b_cat = pack_params(wh_t, bh, wg_t, bg, dim_p)

    out = highway_forward(x1, x2, w_cat, b_cat)
    out = jax.block_until_ready(out)

    ref = reference_forward(x1, x2, wh_t, bh, wg_t, bg)
    assert out.shape == (B, S, dim), out.shape
    max_err = float(jnp.max(jnp.abs(out - ref)))
    # bf16 matmul operands + approx-reciprocal sigmoid vs. f32 reference.
    assert max_err < 2e-2, max_err

    print("KERNEL_OK")
</pallas_src>

<mosaic_0001>
module attributes {stable_mosaic.version = 11 : i64} {
  func.func @kernel(%arg0: i32, %arg1: memref<8x16xf32, #tpu.memory_space<vmem>>, %arg2: memref<8x16xf32, #tpu.memory_space<vmem>>, %arg3: memref<2x128x256xbf16, #tpu.memory_space<vmem>>, %arg4: memref<2x1x256xf32, #tpu.memory_space<vmem>>, %arg5: memref<8x32xf32, #tpu.memory_space<vmem>>, %arg6: memref<8x128xf32, #tpu.memory_space<vmem>>) attributes {dimension_semantics = [#tpu.dimension_semantics<parallel>], iteration_bounds = array<i64: 2>, scalar_prefetch = 0 : i64, scratch_operands = 1 : i64, tpu.core_type = #tpu.core_type<tc>, window_params = [{transform_indices = @transform_0, window_bounds = array<i64: 8, 16>}, {transform_indices = @transform_1, window_bounds = array<i64: 8, 16>}, {pipeline_mode = #tpu.pipeline_mode<synchronous>, transform_indices = @transform_2, window_bounds = array<i64: 2, 128, 256>}, {pipeline_mode = #tpu.pipeline_mode<synchronous>, transform_indices = @transform_3, window_bounds = array<i64: 2, 1, 256>}, {transform_indices = @transform_4, window_bounds = array<i64: 8, 32>}]} {
    %cst = arith.constant 0.000000e+00 : f32
    %0 = vector.broadcast %cst : f32 to vector<8x96xf32>
    %c0 = arith.constant 0 : index
    %c32 = arith.constant 32 : index
    %1 = vector.load %arg6[%c0, %c32] : memref<8x128xf32, #tpu.memory_space<vmem>>, vector<8x96xf32>
    tpu.vector_store %arg6[%c0, %c32], %0 {strides = array<i32>} : memref<8x128xf32, #tpu.memory_space<vmem>>, vector<8x96xf32>,
    %c0_0 = arith.constant 0 : index
    %c0_1 = arith.constant 0 : index
    %2 = vector.load %arg1[%c0_0, %c0_1] : memref<8x16xf32, #tpu.memory_space<vmem>>, vector<8x16xf32>
    %c0_2 = arith.constant 0 : index
    %c0_3 = arith.constant 0 : index
    %3 = vector.load %arg6[%c0_2, %c0_3] : memref<8x128xf32, #tpu.memory_space<vmem>>, vector<8x16xf32>
    tpu.vector_store %arg6[%c0_2, %c0_3], %2 {strides = array<i32>} : memref<8x128xf32, #tpu.memory_space<vmem>>, vector<8x16xf32>,
    %c0_4 = arith.constant 0 : index
    %c0_5 = arith.constant 0 : index
    %4 = vector.load %arg2[%c0_4, %c0_5] : memref<8x16xf32, #tpu.memory_space<vmem>>, vector<8x16xf32>
    %c0_6 = arith.constant 0 : index
    %c16 = arith.constant 16 : index
    %5 = vector.load %arg6[%c0_6, %c16] : memref<8x128xf32, #tpu.memory_space<vmem>>, vector<8x16xf32>
    tpu.vector_store %arg6[%c0_6, %c16], %4 {strides = array<i32>} : memref<8x128xf32, #tpu.memory_space<vmem>>, vector<8x16xf32>,
    %c0_7 = arith.constant 0 : index
    %c0_8 = arith.constant 0 : index
    %6 = vector.load %arg6[%c0_7, %c0_8] : memref<8x128xf32, #tpu.memory_space<vmem>>, vector<8x128xf32>
    %7 = arith.truncf %6 : vector<8x128xf32> to vector<8x128xbf16>
    %c0_9 = arith.constant 0 : index
    %c0_10 = arith.constant 0 : index
    %c0_11 = arith.constant 0 : index
    %8 = vector.load %arg3[%c0_9, %c0_10, %c0_11] : memref<2x128x256xbf16, #tpu.memory_space<vmem>>, vector<1x128x256xbf16>
    %9 = vector.shape_cast %8 : vector<1x128x256xbf16> to vector<128x256xbf16>
    %cst_12 = arith.constant dense<0.000000e+00> : vector<8x256xf32>
    %10 = tpu.matmul %7, %9, %cst_12 {dimension_numbers = #tpu.dot_dimension_numbers<[1], [0], [0], [1], [0, 0, 1, 1], [], []>} : vector<8x128xbf16>, vector<128x256xbf16>, vector<8x256xf32> -> vector<8x256xf32>
    %c0_13 = arith.constant 0 : index
    %c0_14 = arith.constant 0 : index
    %c0_15 = arith.constant 0 : index
    %11 = vector.load %arg4[%c0_13, %c0_14, %c0_15] : memref<2x1x256xf32, #tpu.memory_space<vmem>>, vector<1x1x256xf32>
    %12 = vector.shape_cast %11 : vector<1x1x256xf32> to vector<1x256xf32>
    %13 = vector.broadcast %12 : vector<1x256xf32> to vector<8x256xf32>
    %14 = arith.addf %10, %13 : vector<8x256xf32>
    %15 = vector.extract_strided_slice %14 {offsets = [0, 0], sizes = [8, 128], strides = [1, 1]} : vector<8x256xf32> to vector<8x128xf32>
    %cst_16 = arith.constant 0.000000e+00 : f32
    %16 = vector.broadcast %cst_16 : f32 to vector<8x128xf32>
    %17 = arith.maximumf %15, %16 : vector<8x128xf32>
    %18 = vector.extract_strided_slice %14 {offsets = [0, 128], sizes = [8, 128], strides = [1, 1]} : vector<8x256xf32> to vector<8x128xf32>
    %cst_17 = arith.constant 0.000000e+00 : f32
    %19 = vector.broadcast %cst_17 : f32 to vector<8x128xf32>
    %20 = arith.subf %19, %18 : vector<8x128xf32>
    %21 = math.exp %20 : vector<8x128xf32>
    %cst_18 = arith.constant 1.000000e+00 : f32
    %22 = vector.broadcast %cst_18 : f32 to vector<8x128xf32>
    %23 = arith.addf %22, %21 : vector<8x128xf32>
    %24 = tpu.reciprocal %23 {approx = true} : vector<8x128xf32> -> vector<8x128xf32>
    %25 = arith.subf %6, %17 : vector<8x128xf32>
    %26 = arith.mulf %24, %25 : vector<8x128xf32>
    %27 = arith.addf %17, %26 : vector<8x128xf32>
    %28 = arith.truncf %27 : vector<8x128xf32> to vector<8x128xbf16>
    %c1 = arith.constant 1 : index
    %c0_19 = arith.constant 0 : index
    %c0_20 = arith.constant 0 : index
    %29 = vector.load %arg3[%c1, %c0_19, %c0_20] : memref<2x128x256xbf16, #tpu.memory_space<vmem>>, vector<1x128x256xbf16>
    %30 = vector.shape_cast %29 : vector<1x128x256xbf16> to vector<128x256xbf16>
    %cst_21 = arith.constant dense<0.000000e+00> : vector<8x256xf32>
    %31 = tpu.matmul %28, %30, %cst_21 {dimension_numbers = #tpu.dot_dimension_numbers<[1], [0], [0], [1], [0, 0, 1, 1], [], []>} : vector<8x128xbf16>, vector<128x256xbf16>, vector<8x256xf32> -> vector<8x256xf32>
    %c1_22 = arith.constant 1 : index
    %c0_23 = arith.constant 0 : index
    %c0_24 = arith.constant 0 : index
    %32 = vector.load %arg4[%c1_22, %c0_23, %c0_24] : memref<2x1x256xf32, #tpu.memory_space<vmem>>, vector<1x1x256xf32>
    %33 = vector.shape_cast %32 : vector<1x1x256xf32> to vector<1x256xf32>
    %34 = vector.broadcast %33 : vector<1x256xf32> to vector<8x256xf32>
    %35 = arith.addf %31, %34 : vector<8x256xf32>
    %36 = vector.extract_strided_slice %35 {offsets = [0, 0], sizes = [8, 128], strides = [1, 1]} : vector<8x256xf32> to vector<8x128xf32>
    %cst_25 = arith.constant 0.000000e+00 : f32
    %37 = vector.broadcast %cst_25 : f32 to vector<8x128xf32>
    %38 = arith.maximumf %36, %37 : vector<8x128xf32>
    %39 = vector.extract_strided_slice %35 {offsets = [0, 128], sizes = [8, 128], strides = [1, 1]} : vector<8x256xf32> to vector<8x128xf32>
    %cst_26 = arith.constant 0.000000e+00 : f32
    %40 = vector.broadcast %cst_26 : f32 to vector<8x128xf32>
    %41 = arith.subf %40, %39 : vector<8x128xf32>
    %42 = math.exp %41 : vector<8x128xf32>
    %cst_27 = arith.constant 1.000000e+00 : f32
    %43 = vector.broadcast %cst_27 : f32 to vector<8x128xf32>
    %44 = arith.addf %43, %42 : vector<8x128xf32>
    %45 = tpu.reciprocal %44 {approx = true} : vector<8x128xf32> -> vector<8x128xf32>
    %46 = arith.subf %27, %38 : vector<8x128xf32>
    %47 = arith.mulf %45, %46 : vector<8x128xf32>
    %48 = arith.addf %38, %47 : vector<8x128xf32>
    %49 = vector.extract_strided_slice %48 {offsets = [0, 0], sizes = [8, 32], strides = [1, 1]} : vector<8x128xf32> to vector<8x32xf32>
    %c0_28 = arith.constant 0 : index
    %c0_29 = arith.constant 0 : index
    %50 = vector.load %arg5[%c0_28, %c0_29] : memref<8x32xf32, #tpu.memory_space<vmem>>, vector<8x32xf32>
    tpu.vector_store %arg5[%c0_28, %c0_29], %49 {strides = array<i32>} : memref<8x32xf32, #tpu.memory_space<vmem>>, vector<8x32xf32>,
    return
  }
  func.func @transform_0(%arg0: i32) -> (i32, i32) {
    %c0_i32 = arith.constant 0 : i32
    %c0_i32_0 = arith.constant 0 : i32
    return %arg0, %c0_i32 : i32, i32
  }
  func.func @transform_1(%arg0: i32) -> (i32, i32) {
    %c0_i32 = arith.constant 0 : i32
    %c0_i32_0 = arith.constant 0 : i32
    return %arg0, %c0_i32 : i32, i32
  }
  func.func @transform_2(%arg0: i32) -> (i32, i32, i32) {
    %c0_i32 = arith.constant 0 : i32
    %c0_i32_0 = arith.constant 0 : i32
    %c0_i32_1 = arith.constant 0 : i32
    %c0_i32_2 = arith.constant 0 : i32
    return %c0_i32, %c0_i32_0, %c0_i32_1 : i32, i32, i32
  }
  func.func @transform_3(%arg0: i32) -> (i32, i32, i32) {
    %c0_i32 = arith.constant 0 : i32
    %c0_i32_0 = arith.constant 0 : i32
    %c0_i32_1 = arith.constant 0 : i32
    %c0_i32_2 = arith.constant 0 : i32
    return %c0_i32, %c0_i32_0, %c0_i32_1 : i32, i32, i32
  }
  func.func @transform_4(%arg0: i32) -> (i32, i32) {
    %c0_i32 = arith.constant 0 : i32
    %c0_i32_0 = arith.constant 0 : i32
    return %arg0, %c0_i32 : i32, i32
  }
}

</mosaic_0001>

<bundles_post_ra>
// kernel: tpu_custom_call.1
= control target key start
LH: loop header
LB: loop body
LE: loop exit
PB: predicated region body
PF: predicated region fallthrough
CT: control target
= control target key end

     0   :  { %s1327_s0 = inlined_call_operand.hbm [shape: f32[16,16], index: 0, kind: input, shape index: {}]   ;;  %s1328_s1 = inlined_call_operand.hbm [shape: f32[16,16], index: 1, kind: input, shape index: {}]   ;;  %s1329_s2 = inlined_call_operand.hbm [shape: bf16[2,128,256], index: 2, kind: input, shape index: {}]   ;;  %s1330_s3 = inlined_call_operand.vmem [shape: f32[2,1,256], index: 3, kind: input, shape index: {}]   ;;  %s1331_s4 = inlined_call_operand.hbm [shape: f32[16,32], index: 4, kind: output, shape index: {}]  }
   0x1   :  { %1336 = sst [smem:[#allocation14_spill]] %s1329_s2 }
   0x2   :  { %9 = vsyncpa [#allocation4], 0 }
   0x3   :  { %11 = vsyncpa [#allocation4 + $0x1], 0 }
   0x4   :  { %12 = vsyncpa [#allocation7], 0 }
   0x5   :  { %14 = vsyncpa [#allocation7 + $0x1], 0 }
   0x6   :  { %15 = vsyncpa [#allocation5], 0 }
   0x7   :  { %17 = vsyncpa [#allocation5 + $0x1], 0  ;;  %s1086_s15 = smov 0   ;;  %s1088_s16 = smov 0  }
   0x8   :  { %s1090_s17 = smov 0   ;;  %s1092_s18 = smov 0  }
   0x9 LB: > { %s1107_s19 = sadd.s32 4294967295, %s1050_s18   ;;  %s716_s20 = sadd.s32 4294967294, %s1050_s18   ;;  %s1050_s18 = sphi %s1092_s18, %s1355_s18   ;;  %s1046_s17 = sphi %s1090_s17, %s1354_s17   ;;  %s1042_s16 = sphi %s1088_s16, %s1353_s16   ;;  %s1038_s15 = sphi %s1086_s15, %s1352_s15  }
   0xa   : > { %p43_p0 = scmp.ne.s32.totalorder %s1042_s16, %s1038_s15  ;;  %p1332_p1 = scmp.eq.s32.totalorder %s1107_s19, 0 }
   0xb   : > { %p141_p3 = scmp.eq.s32.totalorder %s716_s20, 1  ;;  %p717_p5 = scmp.ge.s32.totalorder %s1050_s18, 1 }
   0xc   : > { %p1116_p4 = por %p1332_p1, %p43_p0  ;;  %p148_p7 = scmp.lt.s32.totalorder %s1050_s18, 3 }
   0xd   : > { %p1121_p6 = por %p141_p3, %p43_p0  ;;  %s1052_s24 = smov [#allocation8]  }
   0xe   : > { %s1337_s21 = scalar_select %p1116_p4, 1, 0 }
   0xf   : > { %s1338_s22 = scalar_select %p1121_p6, 1, 0 }
  0x10   : > { %p1126_p8 = pnand %p717_p5, %p148_p7  ;;  %s160_s25 = sshll.u32 %s1052_s24, 4  ;;  %s1130_s25 = int_to_ptr.vmem [resolvable:$true] %s160_s25 }
  0x11   : > { %s1142_s27 = sadd.s32 1, %s1050_s18   ;;  %s30_s28 = sadd.s32 1, %s1046_s17 }
  0x12   : > { %s1339_s23 = scalar_select %p1126_p8, 1, 0 }
  0x13   : > { %p776_p9 = pneg %p1126_p8  ;;  %s27_s29 = ssub.s32 %s1050_s18, %s1142_s27 }
  0x14   : > { %s1341_s2 = sld [smem:[#allocation14_spill]] }
  0x15   : > { %p1137_p11 = pnand %p776_p9, %p1332_p1 }
  0x17   : > { %p890_p13 = pneg %p1137_p11 }
  0x1a   : > { %s888_s6 = scalar_lea.hbm %s1341_s2, 4096 }
  0x1b   : > { %p889_p12 = scmp.ne.s32.totalorder %s1341_s2, %s888_s6  ;;  %p895_p5 = scmp.lt.u32.totalorder %s888_s6, %s1341_s2 }
  0x1d   : > { %p891_p0 = pnand %p890_p13, %p889_p12 }
  0x1f   : > { %p892_p3 = pneg %p891_p0 }
  0x21   : > { %p897_p7 = pnand %p895_p5, %p892_p3 }
  0x23   : > { %900 = shalt.err (!%p897_p7)
}
  0x24   : > { %s901_s11 = scalar_lea.vmem %s1130_s25, 4096  ;;  %p909_p2 = scmp.lt.s32.totalorder %s1130_s25, %s1130_s25 }
  0x25   : > { %p902_p9 = scmp.ne.s32.totalorder %s1130_s25, %s901_s11  ;;  %p910_p6 = scmp.lt.s32.totalorder %s901_s11, %s901_s11 }
  0x27   : > { %p904_p10 = pnand %p902_p9, %p890_p13  ;;  %p911_p4 = por %p910_p6, %p909_p2 }
  0x29   : > { %p905_p1 = pneg %p904_p10 }
  0x2b   : > { %p912_p8 = pnand %p911_p4, %p905_p1 }
  0x2d   : > { %915 = shalt.err (!%p912_p8)
}
  0x2e   : > { %s1053_s12 = smov 128   ;;  %s1054_s13 = smov 8  }
  0x2f   : > { %779 = dma.hbm_to_vmem [thread:$0]  (!%p1137_p11), %s1341_s2, 4096, %s1130_s25, [#allocation7], %s1053_s12, %s1053_s12, %s1054_s13  }
  0x30   : > { %p28_p2 = scmp.eq.s32.totalorder %s27_s29, 0  ;;  %p37_p1 = scmp.ne.s32.totalorder %s1046_s17, %s1042_s16 }
  0x31   : > { %p38_p4 = scmp.eq.s32.totalorder %s1050_s18, 0  ;;  %p792_p6 = scmp.lt.s32.totalorder %s1050_s18, 2 }
  0x32   : > { %s1173_s24 = scalar_select %p28_p2, %s1046_s17, %s30_s28  }
  0x33   : > { %p39_p8 = por %p38_p4, %p37_p1  ;;  %p1342_p10 = scmp.eq.s32.totalorder %s1107_s19, 1 }
  0x34   : > { %s177_s5 = sand.u32 1, %s1046_s17   ;;  %s721_s6 = sshll.u32 %s1050_s18, 7 }
  0x35   : > { %p1177_p12 = por %p1342_p10, %p37_p1  ;;  %s1183_s7 = sshll.u32 %s177_s5, 3 }
  0x36   : > { %s1188_s25 = scalar_lea.hbm %s1327_s0, %s721_s6  ;;  %s181_s28 = scalar_lea.vmem [#allocation3], %s1183_s7 }
  0x37   : > { %s1343_s30 = scalar_select %p1177_p12, 1, 0 }
  0x38   : > { %s188_s29 = sshll.u32 %s181_s28, 4  ;;  %p1191_p11 = pnand %p792_p6, %p39_p8  ;;  %s1195_s29 = int_to_ptr.vmem [resolvable:$true] %s188_s29 }
  0x39   : > { %s1200_s12 = scalar_lea.hbm %s1328_s1, %s721_s6  ;;  %s178_s13 = scalar_lea.sflag [#allocation4], %s177_s5 }
  0x3a   : > { %s916_s14 = scalar_lea.hbm %s1188_s25, 128  ;;  %p918_p0 = pneg %p1191_p11 }
  0x3b   : > { %p917_p13 = scmp.ne.s32.totalorder %s1188_s25, %s916_s14  ;;  %s921_s8 = scalar_lea.hbm %s1327_s0, 256 }
  0x3c   : > { %p922_p7 = scmp.lt.u32.totalorder %s1188_s25, %s1327_s0  ;;  %p923_p9 = scmp.lt.u32.totalorder %s921_s8, %s916_s14 }
  0x3d   : > { %p919_p3 = pnand %p918_p0, %p917_p13  ;;  %p925_p1 = scmp.lt.u32.totalorder %s916_s14, %s1188_s25 }
  0x3e   : > { %p924_p2 = por %p923_p9, %p922_p7 }
  0x3f   : > { %p920_p5 = pneg %p919_p3 }
  0x40   : > { %p926_p4 = por %p925_p1, %p924_p2 }
  0x42   : > { %p927_p6 = pnand %p926_p4, %p920_p5 }
  0x44   : > { %930 = shalt.err (!%p927_p6)
}
  0x45   : > { %s931_s5 = scalar_lea.vmem %s1195_s29, 128  ;;  %s1055_s6 = smov [#allocation3]  }
  0x46   : > { %p932_p8 = scmp.ne.s32.totalorder %s1195_s29, %s931_s5  ;;  %s936_s10 = sshll.u32 %s1055_s6, 4  ;;  %s937_s10 = int_to_ptr.vmem [resolvable:$false] %s936_s10 }
  0x47   : > { %s938_s2 = scalar_lea.vmem %s937_s10, 256  ;;  %p939_p3 = scmp.lt.s32.totalorder %s1195_s29, %s937_s10 }
  0x48   : > { %p934_p10 = pnand %p932_p8, %p918_p0  ;;  %p940_p7 = scmp.lt.s32.totalorder %s938_s2, %s931_s5 }
  0x4a   : > { %p935_p13 = pneg %p934_p10  ;;  %p941_p9 = por %p940_p7, %p939_p3 }
  0x4c   : > { %p942_p2 = pnand %p941_p9, %p935_p13 }
  0x4e   : > { %945 = shalt.err (!%p942_p2)
}
  0x4f   : > { %783 = dma.hbm_to_vmem [thread:$0]  (!%p1191_p11), %s1188_s25, 128, %s1195_s29, %s178_s13  }
  0x50   : > { %s195_s11 = sand.u32 1, %s1050_s18   ;;  %s199_s14 = scalar_lea.vmem [#allocation6], %s1183_s7 }
  0x51   : > { %s206_s20 = sshll.u32 %s199_s14, 4  ;;  %s196_s26 = scalar_lea.sflag [#allocation7], %s195_s11  ;;  %s207_s20 = int_to_ptr.vmem [resolvable:$true] %s206_s20 }
  0x52   : > { %s946_s8 = scalar_lea.hbm %s1200_s12, 128  ;;  %s951_s6 = scalar_lea.hbm %s1328_s1, 256 }
  0x53   : > { %p947_p5 = scmp.ne.s32.totalorder %s1200_s12, %s946_s8  ;;  %p952_p6 = scmp.lt.u32.totalorder %s1200_s12, %s1328_s1 }
  0x54   : > { %p953_p8 = scmp.lt.u32.totalorder %s951_s6, %s946_s8  ;;  %p955_p13 = scmp.lt.u32.totalorder %s946_s8, %s1200_s12 }
  0x55   : > { %p949_p1 = pnand %p947_p5, %p918_p0 }
  0x56   : > { %p954_p10 = por %p953_p8, %p952_p6 }
  0x57   : > { %p950_p4 = pneg %p949_p1 }
  0x58   : > { %p956_p3 = por %p955_p13, %p954_p10 }
  0x5a   : > { %p957_p7 = pnand %p956_p3, %p950_p4 }
  0x5c   : > { %960 = shalt.err (!%p957_p7)
}
  0x5d   : > { %s961_s7 = scalar_lea.vmem %s207_s20, 128  ;;  %s1056_s25 = smov [#allocation6]  }
  0x5e   : > { %p962_p9 = scmp.ne.s32.totalorder %s207_s20, %s961_s7  ;;  %s966_s29 = sshll.u32 %s1056_s25, 4  ;;  %s967_s29 = int_to_ptr.vmem [resolvable:$false] %s966_s29 }
  0x5f   : > { %s968_s13 = scalar_lea.vmem %s967_s29, 256  ;;  %p969_p1 = scmp.lt.s32.totalorder %s207_s20, %s967_s29 }
  0x60   : > { %p964_p2 = pnand %p962_p9, %p918_p0  ;;  %p970_p12 = scmp.lt.s32.totalorder %s968_s13, %s961_s7 }
  0x62   : > { %p965_p5 = pneg %p964_p2  ;;  %p971_p6 = por %p970_p12, %p969_p1 }
  0x64   : > { %p972_p8 = pnand %p971_p6, %p965_p5 }
  0x66   : > { %975 = shalt.err (!%p972_p8)
}
  0x67   : > { %786 = dma.hbm_to_vmem [thread:$0]  (!%p1191_p11), %s1200_s12, 128, %s207_s20, %s196_s26  }
  0x68   : > { %p1345_p4 = scmp.ne.s32.totalorder %s1339_s23, 0 }
  0x69   : > { %s1251_s11 = sand.u32 (!%p1345_p4), 1, %s1042_s16   ;;  %p1346_p12 = scmp.ne.s32.totalorder (!%p1345_p4), %s1337_s21, 0 }
  0x6a   : > { %215 = sbr.rel (%p1345_p4) target bundleno = 757 (0x2f5), region = 36  ;;  %s1254_s14 = sshll.u32 (!%p1345_p4), %s1251_s11, 3 }
  0x6b   : > { %s218_s8 = scalar_lea.sflag (!%p1345_p4), [#allocation4], %s1251_s11  ;;  %s221_s28 = scalar_lea.vmem (!%p1345_p4), [#allocation3], %s1254_s14 }
  0x71   : > { %1021 = dma.done.wait (%p1346_p12), %s218_s8, 128  }
  0x72   : > { %1023 = vsyncadd (%p1346_p12), %s218_s8, 4294967168  ;;  %s226_s23 = sand.u32 1, %s1107_s19   ;;  %s230_s12 = scalar_lea.vmem [#allocation6], %s1254_s14 }
  0x73   : > { %s227_s9 = scalar_lea.sflag [#allocation7], %s226_s23 }
  0x74   : > { %1025 = dma.done.wait (%p1346_p12), %s227_s9, 128  }
  0x75   : > { %1027 = vsyncadd (%p1346_p12), %s227_s9, 4294967168  ;;  %p1347_p11 = scmp.eq.s32.totalorder %s1107_s19, 0 }
  0x77   : > { %1029 = dma.done.wait (%p1347_p11), [#allocation7], 4096   ;;  %p1348_p0 = pmov %p1347_p11 }
  0x78   : > { %vm265_vm0 = vcmask 1047808   ;;  %v1057_v0 = vmov 0.0   ;;  %v1058_v1 = vmov 0   ;;  %v270_v2 = vld [vmem:[%s230_s12] sm:$0xff]  ;;  %s1059_s20 = smov 16   ;;  %vm268_vm1 = vcmask 130048  }
  0x79   : > { %1031 = vsyncadd (%p1348_p0), [#allocation7], 4294963200  ;;  %266 = vst.msk [vmem:[#allocation2] sm:$0xff] %vm265_vm0, %v1057_v0  ;;  %419 = vmatprep.mubr.bf16.mxu0 %v1058_v1  ;;  %580 = vmatprep.mubr.bf16.mxu1 %v1058_v1  ;;  %v833_v3 = vld [vmem:[#allocation8 + $0x4] ss:$8 sps:$4 sm:$0xff]   ;;  %v289_v14 = vld [vmem:[#allocation8 + $0x50] sm:$0xff]  ;;  %v297_v41 = vlaneseq }
  0x7a   : > { %272 = vrot.lane.b32.xlu0 %v270_v2, %s1059_s20  ;;  %v835_v4 = vld [vmem:[#allocation8] ss:$8 sps:$4 sm:$0xff]   ;;  %v836_v5 = vld [vmem:[#allocation8 + $0x14] ss:$8 sps:$4 sm:$0xff]   ;;  %387 = vmatprep.subr.bf16.mxu0 %v833_v3  ;;  %v838_v6 = vld [vmem:[#allocation8 + $0x10] ss:$8 sps:$4 sm:$0xff]  }
  0x7b   : > { %388 = vmatpush1.bf16.msra.mxu0 %v835_v4  ;;  %v839_v7 = vld [vmem:[#allocation8 + $0x24] ss:$8 sps:$4 sm:$0xff]   ;;  %v841_v8 = vld [vmem:[#allocation8 + $0x20] ss:$8 sps:$4 sm:$0xff]   ;;  %v842_v10 = vld [vmem:[#allocation8 + $0x34] ss:$8 sps:$4 sm:$0xff]  }
  0x7c   : > { %389 = vmatprep.subr.bf16.mxu0 %v836_v5  ;;  %v267_v9 = vld [vmem:[%s221_s28] sm:$0xff]  ;;  %v844_v11 = vld [vmem:[#allocation8 + $0x30] ss:$8 sps:$4 sm:$0xff]   ;;  %v848_v16 = vld [vmem:[#allocation8 + $0x54] ss:$8 sps:$4 sm:$0xff]   ;;  %vm275_vm2 = vcmask 261248  }
  0x7d   : > { %269 = vst.msk [vmem:[#allocation2] sm:$0xff] %vm268_vm1, %v267_v9  ;;  %v845_v12 = vld [vmem:[#allocation8 + $0x44] ss:$8 sps:$4 sm:$0xff]   ;;  %v847_v13 = vld [vmem:[#allocation8 + $0x40] ss:$8 sps:$4 sm:$0xff]   ;;  %v290_v15 = vld [vmem:[#allocation8 + $0x58] sm:$0xff] }
  0x7e   : > { %v739_v17 = vcombine.low %v289_v14, %v290_v15  ;;  %v850_v18 = vld [vmem:[#allocation8 + $0x64] ss:$8 sps:$4 sm:$0xff]   ;;  %v852_v19 = vld [vmem:[#allocation8 + $0x60] ss:$8 sps:$4 sm:$0xff]   ;;  %v853_v20 = vld [vmem:[#allocation8 + $0x74] ss:$8 sps:$4 sm:$0xff]  }
  0x7f   : > { %390 = vmatpush1.bf16.msra.mxu0 %v838_v6  ;;  %v855_v21 = vld [vmem:[#allocation8 + $0x70] ss:$8 sps:$4 sm:$0xff]   ;;  %v856_v25 = vld [vmem:[#allocation8 + $0x84] ss:$8 sps:$4 sm:$0xff]   ;;  %v858_v26 = vld [vmem:[#allocation8 + $0x80] ss:$8 sps:$4 sm:$0xff]  }
  0x80   : > { %391 = vmatprep.subr.bf16.mxu0 %v839_v7  ;;  %548 = vmatprep.subr.bf16.mxu1 %v856_v25  ;;  %v859_v27 = vld [vmem:[#allocation8 + $0x94] ss:$8 sps:$4 sm:$0xff]   ;;  %v861_v28 = vld [vmem:[#allocation8 + $0x90] ss:$8 sps:$4 sm:$0xff]   ;;  %v862_v29 = vld [vmem:[#allocation8 + $0xa4] ss:$8 sps:$4 sm:$0xff]  }
  0x81   : > { %549 = vmatpush1.bf16.msra.mxu1 %v858_v26  ;;  %v864_v30 = vld [vmem:[#allocation8 + $0xa0] ss:$8 sps:$4 sm:$0xff]   ;;  %v865_v31 = vld [vmem:[#allocation8 + $0xb4] ss:$8 sps:$4 sm:$0xff]   ;;  %v867_v32 = vld [vmem:[#allocation8 + $0xb0] ss:$8 sps:$4 sm:$0xff]  }
  0x82   : > { %550 = vmatprep.subr.bf16.mxu1 %v859_v27  ;;  %v868_v33 = vld [vmem:[#allocation8 + $0xc4] ss:$8 sps:$4 sm:$0xff]   ;;  %v870_v34 = vld [vmem:[#allocation8 + $0xc0] ss:$8 sps:$4 sm:$0xff]   ;;  %v871_v35 = vld [vmem:[#allocation8 + $0xd4] ss:$8 sps:$4 sm:$0xff]  }
  0x83   : > { %392 = vmatpush1.bf16.msra.mxu0 %v841_v8  ;;  %v873_v36 = vld [vmem:[#allocation8 + $0xd0] ss:$8 sps:$4 sm:$0xff]   ;;  %v874_v37 = vld [vmem:[#allocation8 + $0xe4] ss:$8 sps:$4 sm:$0xff]   ;;  %v876_v38 = vld [vmem:[#allocation8 + $0xe0] ss:$8 sps:$4 sm:$0xff]  }
  0x84   : > { %393 = vmatprep.subr.bf16.mxu0 %v842_v10  ;;  %v877_v39 = vld [vmem:[#allocation8 + $0xf4] ss:$8 sps:$4 sm:$0xff]   ;;  %v879_v40 = vld [vmem:[#allocation8 + $0xf0] ss:$8 sps:$4 sm:$0xff]   ;;  %v298_v42 = vshrl.u32 %v297_v41, 7  ;;  %s763_s10 = sshll.u32 %s1107_s19, 7 }
  0x85   : > { %551 = vmatpush1.bf16.msra.mxu1 %v861_v28  ;;  %v295_v44 = vld [vmem:[%s1330_s3] sm:$0x3]  ;;  %v745_v0 = vld [vmem:[%s1330_s3 + $0x2] sm:$0x3]  ;;  %s263_s2 = scalar_lea.vmem [#allocation9], %s1254_s14  ;;  %vm598_vm3 = vcmask 261120   ;;  %s1283_s13 = scalar_lea.hbm %s1331_s4, %s763_s10 }
  0x86   : > { %552 = vmatprep.subr.bf16.mxu1 %v862_v29  ;;  %v303_v43 = vsub.s32 1, %v298_v42  ;;  %v299_v53 = vsub.s32 0, %v298_v42  ;;  %s614_s7 = sshll.u32 %s263_s2, 4  ;;  %s601_s8 = scalar_lea.sflag [#allocation5], %s1251_s11  ;;  %s1285_s7 = int_to_ptr.vmem [resolvable:$true] %s614_s7 }
  0x87   : > { %394 = vmatpush1.bf16.msra.mxu0 %v844_v11  ;;  %s976_s28 = scalar_lea.vmem %s1285_s7, 128  ;;  %p1349_p13 = scmp.ne.s32.totalorder %s1343_s30, 0 }
  0x88   : > { %395 = vmatprep.subr.bf16.mxu0 %v845_v12  ;;  %v304_v45 = vrot.slane %v295_v44, %v303_v43  ;;  %v300_v55 = vrot.slane %v295_v44, %v299_v53  ;;  %v465_v1 = vrot.slane %v745_v0, %v303_v43  ;;  %v461_v10 = vrot.slane %v745_v0, %v299_v53  ;;  %p977_p10 = scmp.ne.s32.totalorder %s1285_s7, %s976_s28  ;;  %s1060_s19 = smov [#allocation9]  }
  0x89   : > { %553 = vmatpush1.bf16.msra.mxu1 %v864_v30  ;;  %s980_s14 = sshll.u32 %s1060_s19, 4  ;;  %s981_s14 = int_to_ptr.vmem [resolvable:$false] %s980_s14 }
  0x8a   : > { %554 = vmatprep.subr.bf16.mxu1 %v865_v31  ;;  %p978_p3 = pnand %p977_p10, %p1349_p13  ;;  %s982_s23 = scalar_lea.vmem %s981_s14, 256 }
  0x8b   : > { %396 = vmatpush1.bf16.msra.mxu0 %v847_v13  ;;  %p983_p9 = scmp.lt.s32.totalorder %s1285_s7, %s981_s14  ;;  %p984_p2 = scmp.lt.s32.totalorder %s982_s23, %s976_s28 }
  0x8c   : > { %397 = vmatprep.subr.bf16.mxu0 %v848_v16  ;;  %p979_p7 = pneg %p978_p3 }
  0x8d   : > { %555 = vmatpush1.bf16.msra.mxu1 %v867_v32  ;;  %p985_p5 = por %p984_p2, %p983_p9 }
  0x8e   : > { %556 = vmatprep.subr.bf16.mxu1 %v868_v33 }
  0x8f   : > { %398 = vmatpush1.bf16.msra.mxu0 %v739_v17  ;;  %p986_p1 = pnand %p985_p5, %p979_p7 }
  0x90   : > { %399 = vmatprep.subr.bf16.mxu0 %v850_v18 }
  0x91   : > { %557 = vmatpush1.bf16.msra.mxu1 %v870_v34 }
  0x92   : > { %558 = vmatprep.subr.bf16.mxu1 %v871_v35 }
  0x93   : > { %400 = vmatpush1.bf16.msra.mxu0 %v852_v19 }
  0x94   : > { %401 = vmatprep.subr.bf16.mxu0 %v853_v20 }
  0x95   : > { %559 = vmatpush1.bf16.msra.mxu1 %v873_v36 }
  0x96   : > { %560 = vmatprep.subr.bf16.mxu1 %v874_v37 }
  0x97   : > { %402 = vmatpush1.bf16.msra.mxu0 %v855_v21 }
  0x99   : > { %561 = vmatpush1.bf16.msra.mxu1 %v876_v38 }
  0x9a   : > { %562 = vmatprep.subr.bf16.mxu1 %v877_v39 }
  0x9d   : > { %563 = vmatpush1.bf16.msra.mxu1 %v879_v40 }
  0xec   : > { %v273_v22 = vpop.permute.xlu0 %272 }
  0xed   : > { %276 = vst.msk [vmem:[#allocation2] sm:$0xff] %vm275_vm2, %v273_v22 }
  0xf4   : > { %v277_v23 = vld [vmem:[#allocation2] sm:$0xff] }
  0xf5   : > { %v278_v24 = vpack.c.bf16 %v277_v23, %v277_v23 }
  0xf7   : > { %420 = vmatmul.mubr.bf16.vlgmr.msra.gmra.mrb[0].mxu0 %v278_v24 }
 0x1ca   : > { %v421_v46 = vpop.f32.mrb[0].mxu0 }
 0x1cb   : > { %v423_v47 = vpop.f32.mrb[1].mxu0  ;;  %v422_v57 = vadd.f32 %v421_v46, %v300_v55 }
 0x1cc   : > { %v424_v48 = vadd.f32 %v423_v47, %v304_v45  ;;  %v425_v49 = vpop.f32.mrb[2].mxu0 }
 0x1cd   : > { %v426_v50 = vpop.f32.mrb[3].mxu0  ;;  %v428_v58 = vmax.f32 %v422_v57, 0.0 }
 0x1ce   : > { %v429_v51 = vsub.f32 0.0, %v424_v48 }
 0x1cf   : > { %v434_v59 = vsub.f32 %v277_v23, %v428_v58 }
 0x1d0   : > { %v430_v52 = vmul.f32 1.442695, %v429_v51 }
 0x1d2   : > { %880 = vpow2.f32 %v430_v52 }
 0x1dc   : > { %v881_v54 = vpop.eup %880 }
 0x1dd   : > { %v432_v56 = vadd.f32 1.0, %v881_v54 }
 0x1df   : > { %882 = vrcp.f32 %v432_v56 }
 0x1e9   : > { %v883_v60 = vpop.eup %882 }
 0x1ea   : > { %v435_v61 = vmul.f32 %v883_v60, %v434_v59 }
 0x1ec   : > { %v436_v62 = vadd.f32 %v435_v61, %v428_v58 }
 0x1ee   : > { %v437_v63 = vpack.c.bf16 %v436_v62, %v436_v62 }
 0x1f0   : > { %581 = vmatmul.mubr.bf16.vlgmr.msra.gmra.mrb[0].mxu1 %v437_v63 }
 0x2c3   : > { %v582_v2 = vpop.f32.mrb[0].mxu1 }
 0x2c4   : > { %v584_v3 = vpop.f32.mrb[1].mxu1  ;;  %v583_v12 = vadd.f32 %v582_v2, %v461_v10 }
 0x2c5   : > { %v585_v4 = vadd.f32 %v584_v3, %v465_v1  ;;  %v586_v5 = vpop.f32.mrb[2].mxu1 }
 0x2c6   : > { %v587_v6 = vpop.f32.mrb[3].mxu1  ;;  %v589_v13 = vmax.f32 %v583_v12, 0.0 }
 0x2c7   : > { %v590_v7 = vsub.f32 0.0, %v585_v4 }
 0x2c8   : > { %v595_v14 = vsub.f32 %v436_v62, %v589_v13 }
 0x2c9   : > { %v591_v8 = vmul.f32 1.442695, %v590_v7 }
 0x2cb   : > { %884 = vpow2.f32 %v591_v8 }
 0x2d5   : > { %v885_v9 = vpop.eup %884 }
 0x2d6   : > { %v593_v11 = vadd.f32 1.0, %v885_v9 }
 0x2d8   : > { %886 = vrcp.f32 %v593_v11 }
 0x2e2   : > { %v887_v15 = vpop.eup %886 }
 0x2e3   : > { %v596_v16 = vmul.f32 %v887_v15, %v595_v14 }
 0x2e5   : > { %v597_v17 = vadd.f32 %v596_v16, %v589_v13 }
 0x2e7   : > { %599 = vst.msk [vmem:[%s263_s2] sm:$0xff] %vm598_vm3, %v597_v17 }
 0x2e8   : > { %989 = shalt.err (!%p986_p1)
}
 0x2e9   : > { %s990_s11 = scalar_lea.hbm %s1283_s13, 128  ;;  %s994_s20 = scalar_lea.hbm %s1331_s4, 256 }
 0x2ea   : > { %p991_p6 = scmp.ne.s32.totalorder %s1283_s13, %s990_s11  ;;  %p995_p12 = scmp.lt.u32.totalorder %s1283_s13, %s1331_s4 }
 0x2eb   : > { %p996_p11 = scmp.lt.u32.totalorder %s994_s20, %s990_s11  ;;  %p998_p10 = scmp.lt.u32.totalorder %s990_s11, %s1283_s13 }
 0x2ec   : > { %p992_p8 = pnand %p991_p6, %p1349_p13 }
 0x2ed   : > { %p997_p0 = por %p996_p11, %p995_p12 }
 0x2ee   : > { %p993_p4 = pneg %p992_p8 }
 0x2ef   : > { %p999_p3 = por %p998_p10, %p997_p0 }
 0x2f1   : > { %p1000_p7 = pnand %p999_p3, %p993_p4 }
 0x2f3   : > { %1003 = shalt.err (!%p1000_p7)
}
 0x2f4   : > { %774 = dma.vmem_to_hbm [thread:$0]  (%p1349_p13), %s1285_s7, 128, %s1283_s13, %s601_s8  }
 0x2f5 PF: > { %s626_s5 = sand.u32 1, %s1038_s15   ;;  %p1350_p9 = scmp.ne.s32.totalorder %s1338_s22, 0 }
 0x2f6   : > { %p1351_p2 = scmp.ge.s32.totalorder %s1050_s18, 2  ;;  %s627_s6 = scalar_lea.sflag [#allocation5], %s626_s5 }
 0x2f8   : > { %p788_p5 = pnand %p1351_p2, %p1350_p9 }
 0x2fa   : > { %1033 = dma.done.wait (!%p788_p5), %s627_s6, 128  }
 0x2fb   : > { %1035 = vsyncadd (!%p788_p5), %s627_s6, 4294967168  ;;  %p20_p1 = scmp.ge.s32.totalorder %s1142_s27, 4   ;;  %s1352_s15 = smov %s1042_s16 }
 0x2fc   : > { %s1353_s16 = smov %s1046_s17  ;;  %s1354_s17 = smov %s1173_s24 }
 0x2fd   : > { %s1355_s18 = smov %s1142_s27  ;;  %22 = sbr.rel (!%p20_p1) target bundleno = 9 (0x9), region = 100 }
 0x304   :  { %632 = vsyncpa [#allocation4], 1 }
 0x305   :  { %634 = vsyncpa [#allocation4 + $0x1], 1 }
 0x306   :  { %635 = vsyncpa [#allocation7], 1 }
 0x307   :  { %637 = vsyncpa [#allocation7 + $0x1], 1 }
 0x308   :  { %638 = vsyncpa [#allocation5], 1 }
 0x309   :  { %640 = vsyncpa [#allocation5 + $0x1], 1 }

</bundles_post_ra>
